<compile_context>
chip_gen: v7x
topology: tpu7x:2x2x1
jax: 0.10.0
libtpu: 0.0.40
codegen_flags: <defaults>
</compile_context>

<pallas_src>
import math

import jax
import jax.numpy as jnp
from jax.experimental import pallas as pl
from jax.experimental.pallas import tpu as pltpu

_LANE = 128
_SUBLANE = 8


def _round_up(n, m):
    return ((n + m - 1) // m) * m


def qnet_kernel(x_ref, w1_ref, b1_ref, w2_ref, b2_ref, out_ref):
    # fc1: (TB, In) @ (In, Hp) + (1, Hp), ReLU on the VPU.
    h = jnp.dot(x_ref[...], w1_ref[...], preferred_element_type=jnp.float32)
    h = jnp.maximum(h + b1_ref[...], 0.0)
    # fc2: (TB, Hp) @ (Hp, Op) + (1, Op)  -- Op is a multiple of 128, so the
    # store below is lane-dense (unmasked vst).
    o = jnp.dot(h, w2_ref[...], preferred_element_type=jnp.float32)
    out_ref[...] = (o + b2_ref[...]).astype(out_ref.dtype)


def qnet_forward(x, w1, b1, w2, b2, *, batch_tile=256):
    """Fused MLP forward: relu(x @ w1 + b1) @ w2 + b2.

    w1: (In, H), b1: (H,), w2: (H, O), b2: (O,).  Returns (B, O) float32.
    """
    B, In = x.shape
    H = w1.shape[1]
    O = w2.shape[1]

    Hp = _round_up(H, _LANE)
    Op = _round_up(O, _LANE)

    # Zero-pad hidden/output feature dims to lane width.  Exact: padded hidden
    # units see zero W2 rows, padded output columns are sliced off.
    w1p = jnp.zeros((In, Hp), jnp.float32).at[:, :H].set(w1)
    b1p = jnp.zeros((1, Hp), jnp.float32).at[:, :H].set(b1.reshape(1, H))
    w2p = jnp.zeros((Hp, Op), jnp.float32).at[:H, :O].set(w2)
    b2p = jnp.zeros((1, Op), jnp.float32).at[:, :O].set(b2.reshape(1, O))

    if B <= batch_tile:
        # Small batch: single block, no grid, everything resident in VMEM.
        Bp = _round_up(B, _SUBLANE)
        xp = jnp.zeros((Bp, In), jnp.float32).at[:B].set(x)
        out = pl.pallas_call(
            qnet_kernel,
            out_shape=jax.ShapeDtypeStruct((Bp, Op), jnp.float32),
            in_specs=[pl.BlockSpec(memory_space=pltpu.MemorySpace.VMEM)] * 5,
            out_specs=pl.BlockSpec(memory_space=pltpu.MemorySpace.VMEM),
        )(xp, w1p, b1p, w2p, b2p)
        return out[:B, :O]

    # Large batch: tile only the batch dim; weights/biases are VMEM-resident
    # (constant index_map -> DMA'd once), activations stream through the
    # pipeline.  "parallel" lets v7x shard batch tiles across its 2 TCs.
    TB = batch_tile
    Bp = _round_up(B, TB)
    xp = jnp.zeros((Bp, In), jnp.float32).at[:B].set(x)
    out = pl.pallas_call(
        qnet_kernel,
        out_shape=jax.ShapeDtypeStruct((Bp, Op), jnp.float32),
        grid=(Bp // TB,),
        in_specs=[
            pl.BlockSpec((TB, In), lambda i: (i, 0)),   # streamed activations
            pl.BlockSpec((In, Hp), lambda i: (0, 0)),   # resident weights
            pl.BlockSpec((1, Hp), lambda i: (0, 0)),
            pl.BlockSpec((Hp, Op), lambda i: (0, 0)),
            pl.BlockSpec((1, Op), lambda i: (0, 0)),
        ],
        out_specs=pl.BlockSpec((TB, Op), lambda i: (i, 0)),
        compiler_params=pltpu.CompilerParams(
            dimension_semantics=("parallel",)
        ),
    )(xp, w1p, b1p, w2p, b2p)
    return out[:B, :O]


def init_linear(key, in_features, out_features):
    """Deterministic init mimicking torch.nn.Linear (uniform +/- 1/sqrt(in)).
    Weight is returned already transposed to (in_features, out_features)."""
    kw, kb = jax.random.split(key)
    bound = 1.0 / math.sqrt(in_features)
    w = jax.random.uniform(
        kw, (in_features, out_features), jnp.float32, -bound, bound
    )
    b = jax.random.uniform(kb, (out_features,), jnp.float32, -bound, bound)
    return w, b


if __name__ == "__main__":
    # Small shapes consistent with QNet(input_size, hidden_size, output_size).
    batch, input_size, hidden_size, output_size = 8, 16, 32, 4

    key = jax.random.PRNGKey(0)
    kx, k1, k2, kx_big = jax.random.split(key, 4)

    w1, b1 = init_linear(k1, input_size, hidden_size)
    w2, b2 = init_linear(k2, hidden_size, output_size)

    def reference(xv):
        return jnp.maximum(xv @ w1 + b1, 0.0) @ w2 + b2

    # --- small-batch path (single block, no grid) ---
    x = jax.random.normal(kx, (batch, input_size), jnp.float32)
    out = qnet_forward(x, w1, b1, w2, b2)
    jax.block_until_ready(out)
    assert out.shape == (batch, output_size)
    assert jnp.allclose(out, reference(x), atol=1e-5, rtol=1e-5)

    # --- batch-tiled path (grid over batch, resident weights) ---
    big_batch = 512
    x_big = jax.random.normal(kx_big, (big_batch, input_size), jnp.float32)
    out_big = qnet_forward(x_big, w1, b1, w2, b2, batch_tile=128)
    jax.block_until_ready(out_big)
    assert out_big.shape == (big_batch, output_size)
    assert jnp.allclose(out_big, reference(x_big), atol=1e-5, rtol=1e-5)

    print("KERNEL_OK")
</pallas_src>

<mosaic_0001>
module attributes {stable_mosaic.version = 11 : i64} {
  func.func @qnet_kernel(%arg0: memref<8x16xf32, #tpu.memory_space<vmem>>, %arg1: memref<16x128xf32, #tpu.memory_space<vmem>>, %arg2: memref<1x128xf32, #tpu.memory_space<vmem>>, %arg3: memref<128x128xf32, #tpu.memory_space<vmem>>, %arg4: memref<1x128xf32, #tpu.memory_space<vmem>>, %arg5: memref<8x128xf32, #tpu.memory_space<vmem>>) attributes {dimension_semantics = [], scalar_prefetch = 0 : i64, scratch_operands = 0 : i64, tpu.core_type = #tpu.core_type<tc>} {
    %c0 = arith.constant 0 : index
    %c0_0 = arith.constant 0 : index
    %0 = vector.load %arg0[%c0, %c0_0] : memref<8x16xf32, #tpu.memory_space<vmem>>, vector<8x16xf32>
    %c0_1 = arith.constant 0 : index
    %c0_2 = arith.constant 0 : index
    %1 = vector.load %arg1[%c0_1, %c0_2] : memref<16x128xf32, #tpu.memory_space<vmem>>, vector<16x128xf32>
    %cst = arith.constant dense<0.000000e+00> : vector<8x128xf32>
    %2 = tpu.matmul %0, %1, %cst {dimension_numbers = #tpu.dot_dimension_numbers<[1], [0], [0], [1], [0, 0, 1, 1], [], []>} : vector<8x16xf32>, vector<16x128xf32>, vector<8x128xf32> -> vector<8x128xf32>
    %c0_3 = arith.constant 0 : index
    %c0_4 = arith.constant 0 : index
    %3 = vector.load %arg2[%c0_3, %c0_4] : memref<1x128xf32, #tpu.memory_space<vmem>>, vector<1x128xf32>
    %4 = vector.broadcast %3 : vector<1x128xf32> to vector<8x128xf32>
    %5 = arith.addf %2, %4 : vector<8x128xf32>
    %cst_5 = arith.constant 0.000000e+00 : f32
    %6 = vector.broadcast %cst_5 : f32 to vector<8x128xf32>
    %7 = arith.maximumf %5, %6 : vector<8x128xf32>
    %c0_6 = arith.constant 0 : index
    %c0_7 = arith.constant 0 : index
    %8 = vector.load %arg3[%c0_6, %c0_7] : memref<128x128xf32, #tpu.memory_space<vmem>>, vector<128x128xf32>
    %cst_8 = arith.constant dense<0.000000e+00> : vector<8x128xf32>
    %9 = tpu.matmul %7, %8, %cst_8 {dimension_numbers = #tpu.dot_dimension_numbers<[1], [0], [0], [1], [0, 0, 1, 1], [], []>} : vector<8x128xf32>, vector<128x128xf32>, vector<8x128xf32> -> vector<8x128xf32>
    %c0_9 = arith.constant 0 : index
    %c0_10 = arith.constant 0 : index
    %10 = vector.load %arg4[%c0_9, %c0_10] : memref<1x128xf32, #tpu.memory_space<vmem>>, vector<1x128xf32>
    %11 = vector.broadcast %10 : vector<1x128xf32> to vector<8x128xf32>
    %12 = arith.addf %9, %11 : vector<8x128xf32>
    %c0_11 = arith.constant 0 : index
    %c0_12 = arith.constant 0 : index
    %13 = vector.load %arg5[%c0_11, %c0_12] : memref<8x128xf32, #tpu.memory_space<vmem>>, vector<8x128xf32>
    tpu.vector_store %arg5[%c0_11, %c0_12], %12 {strides = array<i32>} : memref<8x128xf32, #tpu.memory_space<vmem>>, vector<8x128xf32>,
    return
  }
}

</mosaic_0001>

<bundles_post_ra>
// kernel: tpu_custom_call.1
= control target key start
LH: loop header
LB: loop body
LE: loop exit
PB: predicated region body
PF: predicated region fallthrough
CT: control target
= control target key end

     0   :  { %10 = vsyncpa [#allocation3], 0  ;;  %s549_s0 = inlined_call_operand.hbm [shape: f32[8,16], index: 0, kind: input, shape index: {}]   ;;  %s550_s1 = inlined_call_operand.hbm [shape: f32[16,128], index: 1, kind: input, shape index: {}]   ;;  %s551_s2 = inlined_call_operand.vmem [shape: f32[1,128], index: 2, kind: input, shape index: {}]   ;;  %s552_s3 = inlined_call_operand.hbm [shape: f32[128,128], index: 3, kind: input, shape index: {}]   ;;  %s553_s4 = inlined_call_operand.vmem [shape: f32[1,128], index: 4, kind: input, shape index: {}]   ;;  %s554_s5 = inlined_call_operand.hbm [shape: f32[8,128], index: 5, kind: output, shape index: {}]  }
   0x1   :  { %11 = vsyncpa [#allocation6], 0 }
   0x2   :  { %12 = vsyncpa [#allocation4], 0  ;;  %s450_s18 = smov [#allocation5]   ;;  %s356_s22 = scalar_lea.hbm %s550_s1, 256 }
   0x3   :  { %s28_s19 = sshll.u32 %s450_s18, 4  ;;  %p357_p0 = scmp.ne.s32.totalorder %s550_s1, %s356_s22  ;;  %s29_s19 = int_to_ptr.vmem [resolvable:$true] %s28_s19 }
   0x4   :  { %p360_p1 = scmp.lt.u32.totalorder %s356_s22, %s550_s1 }
   0x6   :  { %p362_p2 = pnand %p360_p1, %p357_p0 }
   0x8   :  { %365 = shalt.err (!%p362_p2)
}
   0x9   :  { %s366_s27 = scalar_lea.vmem %s29_s19, 256  ;;  %p371_p4 = scmp.lt.s32.totalorder %s29_s19, %s29_s19 }
   0xa   :  { %p367_p3 = scmp.ne.s32.totalorder %s29_s19, %s366_s27  ;;  %p372_p5 = scmp.lt.s32.totalorder %s366_s27, %s366_s27 }
   0xc   :  { %p373_p6 = por %p372_p5, %p371_p4 }
   0xe   :  { %p374_p7 = pnand %p373_p6, %p367_p3 }
  0x10   :  { %377 = shalt.err (!%p374_p7)
}
  0x11   :  { %s451_s28 = smov 128   ;;  %s452_s29 = smov 8  }
  0x12   :  { %34 = dma.hbm_to_vmem [thread:$0]  %s550_s1, 256, %s29_s19, [#allocation6], %s451_s28, %s451_s28, %s452_s29  }
  0x13   :  { %s453_s7 = smov [#allocation2]   ;;  %s454_s9 = smov [#allocation7]  }
  0x14   :  { %s19_s8 = sshll.u32 %s453_s7, 4  ;;  %s42_s10 = sshll.u32 %s454_s9, 4  ;;  %s20_s8 = int_to_ptr.vmem [resolvable:$true] %s19_s8  ;;  %s43_s10 = int_to_ptr.vmem [resolvable:$true] %s42_s10 }
  0x15   :  { %s378_s13 = scalar_lea.hbm %s549_s0, 128 }
  0x16   :  { %p379_p8 = scmp.ne.s32.totalorder %s549_s0, %s378_s13  ;;  %p382_p9 = scmp.lt.u32.totalorder %s378_s13, %s549_s0 }
  0x18   :  { %p384_p10 = pnand %p382_p9, %p379_p8 }
  0x1a   :  { %387 = shalt.err (!%p384_p10)
}
  0x1b   :  { %s388_s1 = scalar_lea.vmem %s20_s8, 128  ;;  %p393_p12 = scmp.lt.s32.totalorder %s20_s8, %s20_s8 }
  0x1c   :  { %p389_p11 = scmp.ne.s32.totalorder %s20_s8, %s388_s1  ;;  %p394_p13 = scmp.lt.s32.totalorder %s388_s1, %s388_s1 }
  0x1e   :  { %p395_p0 = por %p394_p13, %p393_p12 }
  0x20   :  { %p396_p1 = pnand %p395_p0, %p389_p11 }
  0x22   :  { %399 = shalt.err (!%p396_p1)
}
  0x23   :  { %22 = dma.hbm_to_vmem [thread:$0]  %s549_s0, 128, %s20_s8, [#allocation3]  }
  0x24   :  { %s400_s22 = scalar_lea.hbm %s552_s3, 2048 }
  0x25   :  { %p401_p2 = scmp.ne.s32.totalorder %s552_s3, %s400_s22  ;;  %p404_p3 = scmp.lt.u32.totalorder %s400_s22, %s552_s3 }
  0x27   :  { %p406_p4 = pnand %p404_p3, %p401_p2 }
  0x29   :  { %409 = shalt.err (!%p406_p4)
}
  0x2a   :  { %s410_s27 = scalar_lea.vmem %s43_s10, 2048  ;;  %p415_p6 = scmp.lt.s32.totalorder %s43_s10, %s43_s10 }
  0x2b   :  { %p411_p5 = scmp.ne.s32.totalorder %s43_s10, %s410_s27  ;;  %p416_p7 = scmp.lt.s32.totalorder %s410_s27, %s410_s27 }
  0x2d   :  { %p417_p8 = por %p416_p7, %p415_p6 }
  0x2f   :  { %p418_p9 = pnand %p417_p8, %p411_p5 }
  0x31   :  { %421 = shalt.err (!%p418_p9)
}
  0x32   :  { %48 = dma.hbm_to_vmem [thread:$0]  %s552_s3, 2048, %s43_s10, [#allocation6], %s451_s28, %s451_s28, %s452_s29  }
  0x33   :  { %444 = dma.done.wait [#allocation3], 128  }
  0x34   :  { %445 = vsyncadd [#allocation3], 4294967168 }
  0x35   :  { %446 = dma.done.wait [#allocation6], 2304  }
  0x36   :  { %447 = vsyncadd [#allocation6], 4294964992  ;;  %v455_v0 = vmov 0.0|0.0   ;;  %vm456_vm0 = vmmov 0   ;;  %v457_v1 = vmov 0.0   ;;  %v61_v2 = vld [vmem:[#allocation5] sm:$0xff] }
  0x37   :  { %320 = vmatprep.subr.bf16.mxu0 %v455_v0  ;;  %282 = vmatprep.mubr.msk.f32.mxu0 %vm456_vm0, %v457_v1  ;;  %v62_v3 = vld [vmem:[#allocation5 + $0x8] sm:$0xff]  ;;  %v145_v5 = vld [vmem:[#allocation7] sm:$0xff]  ;;  %v146_v6 = vld [vmem:[#allocation7 + $0x8] sm:$0xff]  ;;  %vm70_vm1 = vcmask 130048   ;;  %s458_s7 = smov [#allocation8]  }
  0x38   :  { %323 = vmatprep.subr.bf16.mxu1 %v455_v0  ;;  %317 = vmatprep.mubr.msk.f32.mxu1 %vm456_vm0, %v457_v1  ;;  %v321_v4 = vpack.c.bf16 %v62_v3, %v61_v2  ;;  %v147_v7 = vld [vmem:[#allocation7 + $0x10] sm:$0xff]  ;;  %v324_v8 = vpack.c.bf16 %v146_v6, %v145_v5  ;;  %v148_v9 = vld [vmem:[#allocation7 + $0x18] sm:$0xff]  ;;  %v60_v10 = vld [vmem:[#allocation2] sm:$0xff]  ;;  %s245_s8 = sshll.u32 %s458_s7, 4  ;;  %s246_s8 = int_to_ptr.vmem [resolvable:$true] %s245_s8 }
  0x39   :  { %v327_v11 = vpack.c.bf16 %v148_v9, %v147_v7  ;;  %v149_v12 = vld [vmem:[#allocation7 + $0x20] sm:$0xff]  ;;  %v150_v13 = vld [vmem:[#allocation7 + $0x28] sm:$0xff]  ;;  %v151_v15 = vld [vmem:[#allocation7 + $0x30] sm:$0xff]  ;;  %s422_s9 = scalar_lea.vmem %s246_s8, 128  ;;  %p427_p11 = scmp.lt.s32.totalorder %s246_s8, %s246_s8 }
  0x3a   :  { %322 = vmatpush3.bf16.msra.mxu0 %v321_v4  ;;  %325 = vmatpush3.bf16.msra.mxu1 %v324_v8  ;;  %v330_v14 = vpack.c.bf16 %v150_v13, %v149_v12  ;;  %v152_v16 = vld [vmem:[#allocation7 + $0x38] sm:$0xff]  ;;  %v153_v18 = vld [vmem:[#allocation7 + $0x40] sm:$0xff]  ;;  %v154_v19 = vld [vmem:[#allocation7 + $0x48] sm:$0xff]  ;;  %p423_p10 = scmp.ne.s32.totalorder %s246_s8, %s422_s9  ;;  %p428_p12 = scmp.lt.s32.totalorder %s422_s9, %s422_s9 }
  0x3b   :  { %326 = vmatprep.subr.bf16.mxu1 %v455_v0  ;;  %v333_v17 = vpack.c.bf16 %v152_v16, %v151_v15  ;;  %v336_v20 = vpack.c.bf16 %v154_v19, %v153_v18  ;;  %v155_v21 = vld [vmem:[#allocation7 + $0x50] sm:$0xff]  ;;  %v156_v22 = vld [vmem:[#allocation7 + $0x58] sm:$0xff]  ;;  %v157_v24 = vld [vmem:[#allocation7 + $0x60] sm:$0xff] }
  0x3c   :  { %v339_v23 = vpack.c.bf16 %v156_v22, %v155_v21  ;;  %v158_v25 = vld [vmem:[#allocation7 + $0x68] sm:$0xff]  ;;  %v159_v27 = vld [vmem:[#allocation7 + $0x70] sm:$0xff]  ;;  %v160_v28 = vld [vmem:[#allocation7 + $0x78] sm:$0xff]  ;;  %p429_p13 = por %p428_p12, %p427_p11 }
  0x3d   :  { %283 = vmatmul.mubr.msk.f32.vlgmr.msra.gmra.mrb[0].mxu0 %vm70_vm1, %v60_v10  ;;  %v342_v26 = vpack.c.bf16 %v158_v25, %v157_v24  ;;  %v345_v29 = vpack.c.bf16 %v160_v28, %v159_v27  ;;  %v255_v30 = vld [vmem:[%s551_s2] ss:$0 sm:$0xff] }
  0x3e   :  { %328 = vmatpush3.bf16.msra.mxu1 %v327_v11  ;;  %v257_v35 = vld [vmem:[%s553_s4] ss:$0 sm:$0xff]  ;;  %p430_p0 = pnand %p429_p13, %p423_p10 }
  0x3f   :  { %329 = vmatprep.subr.bf16.mxu1 %v455_v0 }
  0x42   :  { %331 = vmatpush3.bf16.msra.mxu1 %v330_v14 }
  0x43   :  { %332 = vmatprep.subr.bf16.mxu1 %v455_v0 }
  0x46   :  { %334 = vmatpush3.bf16.msra.mxu1 %v333_v17 }
  0x47   :  { %335 = vmatprep.subr.bf16.mxu1 %v455_v0 }
  0x4a   :  { %337 = vmatpush3.bf16.msra.mxu1 %v336_v20 }
  0x4b   :  { %338 = vmatprep.subr.bf16.mxu1 %v455_v0 }
  0x4e   :  { %340 = vmatpush3.bf16.msra.mxu1 %v339_v23 }
  0x4f   :  { %341 = vmatprep.subr.bf16.mxu1 %v455_v0 }
  0x52   :  { %343 = vmatpush3.bf16.msra.mxu1 %v342_v26 }
  0x53   :  { %344 = vmatprep.subr.bf16.mxu1 %v455_v0 }
  0x56   :  { %346 = vmatpush3.bf16.msra.mxu1 %v345_v29 }
 0x110   :  { %v140_v31 = vpop.f32.mrb[0].mxu0 }
 0x111   :  { %v141_v32 = vadd.f32 %v255_v30, %v140_v31  ;;  %v284_v33 = vpop.f32.mrb[1].mxu0 }
 0x113   :  { %v144_v34 = vmax.f32 %v141_v32, 0.0 }
 0x115   :  { %318 = vmatmul.mubr.f32.vlgmr.msra.gmra.mrb[0].mxu1 %v144_v34 }
 0x1e8   :  { %v234_v36 = vpop.f32.mrb[0].mxu1 }
 0x1e9   :  { %v235_v37 = vadd.f32 %v257_v35, %v234_v36  ;;  %v319_v38 = vpop.f32.mrb[1].mxu1 }
 0x1eb   :  { %238 = vst [vmem:[#allocation8] sm:$0xff] %v235_v37 }
 0x1ec   :  { %433 = shalt.err (!%p430_p0)
}
 0x1ed   :  { %s434_s11 = scalar_lea.hbm %s554_s5, 128 }
 0x1ee   :  { %p435_p1 = scmp.ne.s32.totalorder %s554_s5, %s434_s11  ;;  %p438_p2 = scmp.lt.u32.totalorder %s434_s11, %s554_s5 }
 0x1f0   :  { %p440_p3 = pnand %p438_p2, %p435_p1 }
 0x1f2   :  { %443 = shalt.err (!%p440_p3)
}
 0x1f3   :  { %248 = dma.vmem_to_hbm [thread:$0]  %s246_s8, 128, %s554_s5, [#allocation4]  }
 0x1f4   :  { %448 = dma.done.wait [#allocation4], 128  }
 0x1f5   :  { %449 = vsyncadd [#allocation4], 4294967168 }
 0x1f6   :  { %252 = vsyncpa [#allocation3], 1 }
 0x1f7   :  { %253 = vsyncpa [#allocation6], 1 }
 0x1f8   :  { %254 = vsyncpa [#allocation4], 1 }

</bundles_post_ra>
